<compile_context>
chip_gen: v5e
topology: v5e:2x2
jax: 0.10.0
libtpu: 0.0.40
codegen_flags: <defaults>
</compile_context>

<pallas_src>
import jax
import jax.numpy as jnp
from jax.experimental import pallas as pl
from jax.experimental.pallas import tpu as pltpu

LANE = 128                            # TPU lane width; chunk granularity
MAX_CHUNK = 512                       # max rows gathered per grid step
ONEHOT_VMEM_BUDGET = 4 * 1024 * 1024  # cap for the per-step one-hot intermediate (bytes)


def _round_up(x, m):
    return (x + m - 1) // m * m


def onehot_gather_kernel(param_t_ref, idx_ref, out_ref):
    """Gather a whole CHUNK of table rows with one MXU one-hot matmul.

    param_t_ref : VMEM (OP, Q)  float   transposed, sublane-padded parameter table
    idx_ref     : VMEM (1, CHUNK) int32 question ids for this block
    out_ref     : VMEM (OP, CHUNK)      gathered columns (lane-dense single store)
    """
    q = param_t_ref.shape[1]
    chunk = idx_ref.shape[1]
    # onehot[q, c] = 1.0 where q == idx[c]
    q_iota = jax.lax.broadcasted_iota(jnp.int32, (q, chunk), 0)
    onehot = (q_iota == idx_ref[...]).astype(param_t_ref.dtype)
    out_ref[...] = jnp.dot(
        param_t_ref[...],
        onehot,
        precision=jax.lax.Precision.HIGHEST,       # exact f32 contraction
        preferred_element_type=jnp.float32,
    ).astype(out_ref.dtype)


def noise_ceiling_forward(param_tensor, uid_idx):
    """Pallas equivalent of NoiseCeiling.forward: param_tensor[uid_idx]."""
    Q, O = param_tensor.shape
    N = int(uid_idx.shape[0])
    if N == 0:                                     # degenerate batch guard
        return jnp.zeros((0, O), param_tensor.dtype)

    # ---- choose a lane-dense chunk size (multiple of 128) -------------------
    n_pad = _round_up(N, LANE)
    bytes_per_col = Q * 4                          # one f32 one-hot column
    vmem_cap = max(LANE, (ONEHOT_VMEM_BUDGET // bytes_per_col) // LANE * LANE)
    chunk = min(MAX_CHUNK, n_pad, vmem_cap)
    n_pad = _round_up(n_pad, chunk)

    # ---- wrapper-side layout plumbing (clamp, pad, transpose) ---------------
    idx = jnp.clip(uid_idx.astype(jnp.int32), 0, Q - 1)   # no OOB VMEM reads
    idx = jnp.pad(idx, (0, n_pad - N))                    # pad slots gather row 0
    idx2d = idx.reshape(1, n_pad)

    OP = _round_up(O, 8)                                  # sublane-pad option dim
    param_t = jnp.pad(param_tensor.T, ((0, OP - O), (0, 0)))   # (OP, Q)

    out_t = pl.pallas_call(
        onehot_gather_kernel,
        out_shape=jax.ShapeDtypeStruct((OP, n_pad), param_tensor.dtype),
        grid=(n_pad // chunk,),
        in_specs=[
            # full table resident in VMEM every step (constant index map)
            pl.BlockSpec((OP, Q), lambda i: (0, 0)),
            # per-step block of indices (kept as a vector for the one-hot compare)
            pl.BlockSpec((1, chunk), lambda i: (0, i)),
        ],
        # lane-dense (OP x CHUNK, CHUNK % 128 == 0) output block, one store/step
        out_specs=pl.BlockSpec((OP, chunk), lambda i: (0, i)),
        compiler_params=pltpu.CompilerParams(
            dimension_semantics=("parallel",),     # disjoint blocks -> megacore OK
            vmem_limit_bytes=32 * 1024 * 1024,     # explicit cap (safe on v5e/v6e/v7x)
        ),
    )(param_t, idx2d)

    # back to the PyTorch layout: (N, O)
    return out_t[:O, :N].T


if __name__ == "__main__":
    # Small shapes consistent with the module: (num_questions x num_options)
    # parameter table, a batch of UID indices to look up.
    num_questions = 128
    num_options = 2
    batch = 10

    key = jax.random.PRNGKey(0)
    k_param, k_idx = jax.random.split(key)

    # deterministic stand-in for torch.randn(num_questions, num_options)
    param_tensor = jax.random.normal(
        k_param, (num_questions, num_options), dtype=jnp.float32
    )
    # data[self.UID]: integer question ids
    uid_idx = jax.random.randint(k_idx, (batch,), 0, num_questions, dtype=jnp.int32)

    out = noise_ceiling_forward(param_tensor, uid_idx)
    out = jax.block_until_ready(out)

    # reference: plain JAX gather (semantics of self.param_tensor[data[UID]])
    ref = param_tensor[uid_idx]
    assert out.shape == (batch, num_options)
    assert out.dtype == param_tensor.dtype
    assert jnp.allclose(out, ref), "mismatch vs reference gather"

    print("KERNEL_OK")
</pallas_src>

<mosaic_0001>
module attributes {stable_mosaic.version = 11 : i64} {
  func.func @onehot_gather_kernel(%arg0: i32, %arg1: memref<8x128xf32, #tpu.memory_space<vmem>>, %arg2: memref<1x128xi32, #tpu.memory_space<vmem>>, %arg3: memref<8x128xf32, #tpu.memory_space<vmem>>) attributes {dimension_semantics = [#tpu.dimension_semantics<parallel>], iteration_bounds = array<i64: 1>, scalar_prefetch = 0 : i64, scratch_operands = 0 : i64, tpu.core_type = #tpu.core_type<tc>, window_params = [{pipeline_mode = #tpu.pipeline_mode<synchronous>, transform_indices = @transform_0, window_bounds = array<i64: 8, 128>}, {transform_indices = @transform_1, window_bounds = array<i64: 1, 128>}, {transform_indices = @transform_2, window_bounds = array<i64: 8, 128>}]} {
    %0 = tpu.iota {dimensions = array<i32: 0>} : vector<128x128xi32>
    %c0 = arith.constant 0 : index
    %c0_0 = arith.constant 0 : index
    %1 = vector.load %arg2[%c0, %c0_0] : memref<1x128xi32, #tpu.memory_space<vmem>>, vector<1x128xi32>
    %2 = vector.broadcast %1 : vector<1x128xi32> to vector<128x128xi32>
    %3 = arith.cmpi eq, %0, %2 : vector<128x128xi32>
    %4 = arith.extui %3 : vector<128x128xi1> to vector<128x128xi32>
    %5 = arith.sitofp %4 : vector<128x128xi32> to vector<128x128xf32>
    %c0_1 = arith.constant 0 : index
    %c0_2 = arith.constant 0 : index
    %6 = vector.load %arg1[%c0_1, %c0_2] : memref<8x128xf32, #tpu.memory_space<vmem>>, vector<8x128xf32>
    %cst = arith.constant dense<0.000000e+00> : vector<8x128xf32>
    %7 = tpu.matmul %6, %5, %cst {dimension_numbers = #tpu.dot_dimension_numbers<[1], [0], [0], [1], [0, 0, 1, 1], [], []>, precision = #tpu.contract_precision<fp32>} : vector<8x128xf32>, vector<128x128xf32>, vector<8x128xf32> -> vector<8x128xf32>
    %c0_3 = arith.constant 0 : index
    %c0_4 = arith.constant 0 : index
    %8 = vector.load %arg3[%c0_3, %c0_4] : memref<8x128xf32, #tpu.memory_space<vmem>>, vector<8x128xf32>
    tpu.vector_store %arg3[%c0_3, %c0_4], %7 {strides = array<i32>} : memref<8x128xf32, #tpu.memory_space<vmem>>, vector<8x128xf32>,
    return
  }
  func.func @transform_0(%arg0: i32) -> (i32, i32) {
    %c0_i32 = arith.constant 0 : i32
    %c0_i32_0 = arith.constant 0 : i32
    %c0_i32_1 = arith.constant 0 : i32
    return %c0_i32, %c0_i32_0 : i32, i32
  }
  func.func @transform_1(%arg0: i32) -> (i32, i32) {
    %c0_i32 = arith.constant 0 : i32
    %c0_i32_0 = arith.constant 0 : i32
    return %c0_i32, %arg0 : i32, i32
  }
  func.func @transform_2(%arg0: i32) -> (i32, i32) {
    %c0_i32 = arith.constant 0 : i32
    %c0_i32_0 = arith.constant 0 : i32
    return %c0_i32, %arg0 : i32, i32
  }
}

</mosaic_0001>

<bundles_post_ra>
// kernel: tpu_custom_call.1
= control target key start
LH: loop header
LB: loop body
LE: loop exit
PB: predicated region body
PF: predicated region fallthrough
CT: control target
= control target key end

     0   :  { %7 = vsyncpa [#allocation3], 0  ;;  %s1124_s0 = inlined_call_operand.hbm [shape: f32[8,128], index: 0, kind: input, shape index: {}]   ;;  %s1125_s1 = inlined_call_operand.hbm [shape: s32[1,128], index: 1, kind: input, shape index: {}]   ;;  %s1126_s2 = inlined_call_operand.hbm [shape: f32[8,128], index: 2, kind: output, shape index: {}]  }
   0x1   :  { %8 = vsyncpa [#allocation6], 0 }
   0x2   :  { %9 = vsyncpa [#allocation4], 0  ;;  %s15_s11 = sshll.u32 %s1124_s0, 4  ;;  %s616_s12 = smov [#allocation2]   ;;  %s16_s11 = int_to_ptr.hbm [resolvable:$true] %s15_s11 }
   0x3   :  { %s17_s13 = sshll.u32 %s616_s12, 4  ;;  %s26_s16 = sshll.u32 %s1125_s1, 4  ;;  %s18_s13 = int_to_ptr.vmem [resolvable:$true] %s17_s13  ;;  %s27_s16 = int_to_ptr.hbm [resolvable:$true] %s26_s16 }
   0x4   :  { %20 = dma.hbm_to_vmem [thread:$0]  %s16_s11, 128, %s18_s13, [#allocation3]  }
   0x5   :  { %s617_s17 = smov [#allocation5]  }
   0x6   :  { %s28_s18 = sshll.u32 %s617_s17, 4  ;;  %s29_s18 = int_to_ptr.vmem [resolvable:$true] %s28_s18 }
   0x7   :  { %31 = dma.hbm_to_vmem [thread:$0]  %s27_s16, 16, %s29_s18, [#allocation6]  }
   0x8   :  { %610 = dma.done.wait [#allocation3], 128  }
   0x9   :  { %611 = vsyncadd [#allocation3], 4294967168 }
   0xa   :  { %612 = dma.done.wait [#allocation6], 16  }
   0xb   :  { %613 = vsyncadd [#allocation6], 4294967280  ;;  %v40_v0 = vlaneseq  ;;  %v662_v8 = vld [vmem:[#allocation5] ss:$0 sm:$0xff]  ;;  %v618_v15 = vmov 1.0   ;;  %v619_v16 = vmov 0.0  }
   0xc   :  { %s620_s0 = smov [#allocation7]   ;;  %s457_s21 = sshll.u32 %s1126_s2, 4  ;;  %s458_s21 = int_to_ptr.hbm [resolvable:$true] %s457_s21 }
   0xd   :  { %v642_v1 = vshrl.u32 %v40_v0, 7  ;;  %s455_s1 = sshll.u32 %s620_s0, 4  ;;  %s456_s1 = int_to_ptr.vmem [resolvable:$true] %s455_s1 }
   0xf   :  { %v645_v2 = vadd.s32 120, %v642_v1  ;;  %v648_v3 = vadd.s32 112, %v642_v1  ;;  %v651_v4 = vadd.s32 104, %v642_v1  ;;  %v654_v5 = vadd.s32 96, %v642_v1 }
  0x10   :  { %v657_v6 = vadd.s32 88, %v642_v1  ;;  %v660_v7 = vadd.s32 80, %v642_v1  ;;  %v665_v9 = vadd.s32 72, %v642_v1  ;;  %v668_v10 = vadd.s32 64, %v642_v1 }
  0x11   :  { %v671_v11 = vadd.s32 56, %v642_v1  ;;  %v674_v12 = vadd.s32 48, %v642_v1  ;;  %v677_v13 = vadd.s32 40, %v642_v1  ;;  %v680_v14 = vadd.s32 32, %v642_v1 }
  0x12   :  { %vm74_vm0 = vcmp.eq.s32.totalorder %v645_v2, %v662_v8  ;;  %vm73_vm1 = vcmp.eq.s32.totalorder %v648_v3, %v662_v8  ;;  %vm72_vm2 = vcmp.eq.s32.totalorder %v651_v4, %v662_v8  ;;  %vm71_vm3 = vcmp.eq.s32.totalorder %v654_v5, %v662_v8 }
  0x13   :  { %484 = vmatpush.msk.msra.mxu0 %vm74_vm0, %v618_v15  ;;  %v483_v17 = vsel %vm74_vm0, 1.0, %v619_v16  ;;  %v482_v18 = vsel %vm73_vm1, 1.0, %v619_v16  ;;  %vm70_vm4 = vcmp.eq.s32.totalorder %v657_v6, %v662_v8  ;;  %v481_v19 = vsel %vm72_vm2, 1.0, %v619_v16  ;;  %500 = vmatpush.msk.msra.mxu3 %vm74_vm0, %v618_v15 }
  0x14   :  { %v712_v20 = vsub.f32 %v483_v17, %v483_v17  ;;  %v714_v21 = vsub.f32 %v482_v18, %v482_v18  ;;  %v716_v22 = vsub.f32 %v481_v19, %v481_v19  ;;  %vm69_vm5 = vcmp.eq.s32.totalorder %v660_v7, %v662_v8 }
  0x15   :  { %485 = vmatpush.msk.msra.mxu0 %vm73_vm1, %v618_v15  ;;  %v480_v23 = vsel %vm71_vm3, 1.0, %v619_v16  ;;  %vm68_vm6 = vcmp.eq.s32.totalorder %v665_v9, %v662_v8  ;;  %v479_v24 = vsel %vm70_vm4, 1.0, %v619_v16  ;;  %v735_v25 = vadd.s32 24, %v642_v1  ;;  %501 = vmatpush.msk.msra.mxu3 %vm73_vm1, %v618_v15 }
  0x16   :  { %v151_v26 = vand.u32 4294901760, %v712_v20  ;;  %v157_v27 = vand.u32 4294901760, %v714_v21  ;;  %v163_v28 = vand.u32 4294901760, %v716_v22  ;;  %v744_v29 = vsub.f32 %v480_v23, %v480_v23  ;;  %252 = vmatpush.msra.mxu2 %v712_v20 }
  0x17   :  { %486 = vmatpush.msk.msra.mxu0 %vm72_vm2, %v618_v15  ;;  %v751_v30 = vsub.f32 %v479_v24, %v479_v24  ;;  %vm67_vm7 = vcmp.eq.s32.totalorder %v668_v10, %v662_v8  ;;  %v478_v31 = vsel %vm69_vm5, 1.0, %v619_v16  ;;  %v477_v32 = vsel %vm68_vm6, 1.0, %v619_v16  ;;  %502 = vmatpush.msk.msra.mxu3 %vm72_vm2, %v618_v15 }
  0x18   :  { %v152_v33 = vsub.f32 %v712_v20, %v151_v26  ;;  %v158_v34 = vsub.f32 %v714_v21, %v157_v27  ;;  %v164_v35 = vsub.f32 %v716_v22, %v163_v28  ;;  %v169_v36 = vand.u32 4294901760, %v744_v29  ;;  %255 = vmatpush.msra.mxu2 %v714_v21 }
  0x19   :  { %487 = vmatpush.msk.msra.mxu0 %vm71_vm3, %v618_v15  ;;  %v175_v37 = vand.u32 4294901760, %v751_v30  ;;  %v783_v38 = vsub.f32 %v478_v31, %v478_v31  ;;  %vm66_vm8 = vcmp.eq.s32.totalorder %v671_v11, %v662_v8  ;;  %v787_v39 = vsub.f32 %v477_v32, %v477_v32  ;;  %503 = vmatpush.msk.msra.mxu3 %vm71_vm3, %v618_v15  ;;  %v107_v32 = vld [vmem:[#allocation2] sm:$0xff] }
  0x1a   :  { %v153_v40 = vand.u32 4294901760, %v152_v33  ;;  %v159_v41 = vand.u32 4294901760, %v158_v34  ;;  %v170_v42 = vsub.f32 %v744_v29, %v169_v36  ;;  %258 = vmatpush.msra.mxu2 %v716_v22  ;;  %v798_v43 = vadd.s32 16, %v642_v1 }
  0x1b   :  { %488 = vmatpush.msk.msra.mxu0 %vm70_vm4, %v618_v15  ;;  %v181_v44 = vand.u32 4294901760, %v783_v38  ;;  %v187_v45 = vand.u32 4294901760, %v787_v39  ;;  %vm65_vm9 = vcmp.eq.s32.totalorder %v674_v12, %v662_v8  ;;  %v476_v46 = vsel %vm67_vm7, 1.0, %v619_v16  ;;  %504 = vmatpush.msk.msra.mxu3 %vm70_vm4, %v618_v15 }
  0x1c   :  { %154 = vmatpush.msra.mxu1 %v153_v40  ;;  %v165_v47 = vand.u32 4294901760, %v164_v35  ;;  %v176_v48 = vsub.f32 %v751_v30, %v175_v37  ;;  %v819_v49 = vsub.f32 %v476_v46, %v476_v46  ;;  %v475_v50 = vsel %vm66_vm8, 1.0, %v619_v16  ;;  %261 = vmatpush.msra.mxu2 %v744_v29 }
  0x1d   :  { %489 = vmatpush.msk.msra.mxu0 %vm69_vm5, %v618_v15  ;;  %v182_v51 = vsub.f32 %v783_v38, %v181_v44  ;;  %vm64_vm10 = vcmp.eq.s32.totalorder %v677_v13, %v662_v8  ;;  %v835_v52 = vsub.f32 %v475_v50, %v475_v50  ;;  %v838_v53 = vadd.s32 8, %v642_v1  ;;  %505 = vmatpush.msk.msra.mxu3 %vm69_vm5, %v618_v15 }
  0x1e   :  { %160 = vmatpush.msra.mxu1 %v159_v41  ;;  %v171_v54 = vand.u32 4294901760, %v170_v42  ;;  %v193_v55 = vand.u32 4294901760, %v819_v49  ;;  %vm63_vm11 = vcmp.eq.s32.totalorder %v680_v14, %v662_v8  ;;  %v474_v56 = vsel %vm65_vm9, 1.0, %v619_v16  ;;  %264 = vmatpush.msra.mxu2 %v751_v30 }
  0x1f   :  { %490 = vmatpush.msk.msra.mxu0 %vm68_vm6, %v618_v15  ;;  %v188_v57 = vsub.f32 %v787_v39, %v187_v45  ;;  %v199_v58 = vand.u32 4294901760, %v835_v52  ;;  %v860_v59 = vsub.f32 %v474_v56, %v474_v56  ;;  %vm62_vm12 = vcmp.eq.s32.totalorder %v735_v25, %v662_v8  ;;  %506 = vmatpush.msk.msra.mxu3 %vm68_vm6, %v618_v15 }
  0x20   :  { %166 = vmatpush.msra.mxu1 %v165_v47  ;;  %v177_v60 = vand.u32 4294901760, %v176_v48  ;;  %v473_v61 = vsel %vm64_vm10, 1.0, %v619_v16  ;;  %v472_v62 = vsel %vm63_vm11, 1.0, %v619_v16  ;;  %267 = vmatpush.msra.mxu2 %v783_v38  ;;  %v183_v63 = vand.u32 4294901760, %v182_v51 }
  0x21   :  { %491 = vmatpush.msk.msra.mxu0 %vm67_vm7, %v618_v15  ;;  %v205_v0 = vand.u32 4294901760, %v860_v59  ;;  %v882_v17 = vsub.f32 %v473_v61, %v473_v61  ;;  %vm61_vm13 = vcmp.eq.s32.totalorder %v798_v43, %v662_v8  ;;  %507 = vmatpush.msk.msra.mxu3 %vm67_vm7, %v618_v15  ;;  %v194_v18 = vsub.f32 %v819_v49, %v193_v55 }
  0x22   :  { %172 = vmatpush.msra.mxu1 %v171_v54  ;;  %v893_v19 = vsub.f32 %v472_v62, %v472_v62  ;;  %vm60_vm14 = vcmp.eq.s32.totalorder %v838_v53, %v662_v8  ;;  %v471_v23 = vsel %vm62_vm12, 1.0, %v619_v16  ;;  %270 = vmatpush.msra.mxu2 %v787_v39  ;;  %v189_v24 = vand.u32 4294901760, %v188_v57 }
  0x23   :  { %492 = vmatpush.msk.msra.mxu0 %vm66_vm8, %v618_v15  ;;  %v200_v31 = vsub.f32 %v835_v52, %v199_v58  ;;  %508 = vmatpush.msk.msra.mxu3 %vm66_vm8, %v618_v15  ;;  %v211_v33 = vand.u32 4294901760, %v882_v17  ;;  %v914_v34 = vsub.f32 %v471_v23, %v471_v23  ;;  %vm59_vm15 = vcmp.eq.s32.totalorder %v642_v1, %v662_v8 }
  0x24   :  { %178 = vmatpush.msra.mxu1 %v177_v60  ;;  %v470_v35 = vsel %vm61_vm13, 1.0, %v619_v16  ;;  %273 = vmatpush.msra.mxu2 %v819_v49  ;;  %v206_v40 = vsub.f32 %v860_v59, %v205_v0  ;;  %v469_v41 = vsel %vm60_vm14, 1.0, %v619_v16  ;;  %v195_v42 = vand.u32 4294901760, %v194_v18 }
  0x25   :  { %493 = vmatpush.msk.msra.mxu0 %vm65_vm9, %v618_v15  ;;  %509 = vmatpush.msk.msra.mxu3 %vm65_vm9, %v618_v15  ;;  %v217_v46 = vand.u32 4294901760, %v893_v19  ;;  %v939_v47 = vsub.f32 %v470_v35, %v470_v35  ;;  %v942_v48 = vand.u32 4294901760, %v107_v32  ;;  %v201_v50 = vand.u32 4294901760, %v200_v31 }
  0x26   :  { %184 = vmatpush.msra.mxu1 %v183_v63  ;;  %276 = vmatpush.msra.mxu2 %v835_v52  ;;  %v468_v51 = vsel %vm59_vm15, 1.0, %v619_v16  ;;  %v212_v54 = vsub.f32 %v882_v17, %v211_v33  ;;  %v223_v56 = vand.u32 4294901760, %v914_v34  ;;  %v960_v57 = vsub.f32 %v469_v41, %v469_v41 }
  0x27   :  { %494 = vmatpush.msk.msra.mxu0 %vm64_vm10, %v618_v15  ;;  %510 = vmatpush.msk.msra.mxu3 %vm64_vm10, %v618_v15  ;;  %v141_v60 = vsub.f32 %v107_v32, %v942_v48  ;;  %v207_v16 = vand.u32 4294901760, %v206_v40  ;;  %v218_v61 = vsub.f32 %v893_v19, %v217_v46  ;;  %v229_v62 = vand.u32 4294901760, %v939_v47 }
  0x28   :  { %190 = vmatpush.msra.mxu1 %v189_v24  ;;  %279 = vmatpush.msra.mxu2 %v860_v59  ;;  %v976_v63 = vsub.f32 %v468_v51, %v468_v51  ;;  %v213_v23 = vand.u32 4294901760, %v212_v54  ;;  %v224_v24 = vsub.f32 %v914_v34, %v223_v56  ;;  %v235_v31 = vand.u32 4294901760, %v960_v57 }
  0x29   :  { %495 = vmatpush.msk.msra.mxu0 %vm63_vm11, %v618_v15  ;;  %511 = vmatpush.msk.msra.mxu3 %vm63_vm11, %v618_v15  ;;  %v142_v18 = vand.u32 4294901760, %v141_v60  ;;  %v219_v35 = vand.u32 4294901760, %v218_v61  ;;  %v230_v40 = vsub.f32 %v939_v47, %v229_v62 }
  0x2a   :  { %196 = vmatpush.msra.mxu1 %v195_v42  ;;  %282 = vmatpush.msra.mxu2 %v882_v17  ;;  %v241_v41 = vand.u32 4294901760, %v976_v63  ;;  %v236_v51 = vsub.f32 %v960_v57, %v235_v31 }
  0x2b   :  { %496 = vmatpush.msk.msra.mxu0 %vm62_vm12, %v618_v15  ;;  %512 = vmatpush.msk.msra.mxu3 %vm62_vm12, %v618_v15  ;;  %v143_v32 = vsub.f32 %v141_v60, %v142_v18  ;;  %v231_v54 = vand.u32 4294901760, %v230_v40 }
  0x2c   :  { %202 = vmatpush.msra.mxu1 %v201_v50  ;;  %285 = vmatpush.msra.mxu2 %v893_v19  ;;  %v225_v50 = vand.u32 4294901760, %v224_v24  ;;  %v237_v61 = vand.u32 4294901760, %v236_v51 }
  0x2d   :  { %497 = vmatpush.msk.msra.mxu0 %vm61_vm13, %v618_v15  ;;  %513 = vmatpush.msk.msra.mxu3 %vm61_vm13, %v618_v15  ;;  %v144_v42 = vand.u32 4294901760, %v143_v32 }
  0x2e   :  { %208 = vmatpush.msra.mxu1 %v207_v16  ;;  %288 = vmatpush.msra.mxu2 %v914_v34  ;;  %v242_v16 = vsub.f32 %v976_v63, %v241_v41 }
  0x2f   :  { %498 = vmatpush.msk.msra.mxu0 %vm60_vm14, %v618_v15  ;;  %514 = vmatpush.msk.msra.mxu3 %vm60_vm14, %v618_v15 }
  0x30   :  { %214 = vmatpush.msra.mxu1 %v213_v23  ;;  %291 = vmatpush.msra.mxu2 %v939_v47  ;;  %v243_v23 = vand.u32 4294901760, %v242_v16 }
  0x31   :  { %499 = vmatpush.msk.msra.mxu0 %vm59_vm15, %v618_v15  ;;  %515 = vmatpush.msk.msra.mxu3 %vm59_vm15, %v618_v15 }
  0x32   :  { %220 = vmatpush.msra.mxu1 %v219_v35  ;;  %294 = vmatpush.msra.mxu2 %v960_v57 }
  0x33   :  { %346 = vmatpush.msrb.mxu0 %v151_v26  ;;  %339 = vmatmul.f32.vlgmr.msra.gmra.mxu3 %v142_v18 }
  0x34   :  { %145 = vmatmul.f32.vlgmr.msra.gmra.mxu0 %v144_v42  ;;  %226 = vmatpush.msra.mxu1 %v225_v50 }
  0x35   :  { %350 = vmatpush.msrb.mxu0 %v157_v27  ;;  %297 = vmatpush.msra.mxu2 %v976_v63 }
  0x36   :  { %232 = vmatpush.msra.mxu1 %v231_v54  ;;  %300 = vmatmul.f32.vlgmr.msra.gmra.mxu2 %v141_v60 }
  0x37   :  { %354 = vmatpush.msrb.mxu0 %v163_v28 }
  0x38   :  { %238 = vmatpush.msra.mxu1 %v237_v61 }
  0x39   :  { %358 = vmatpush.msrb.mxu0 %v169_v36 }
  0x3a   :  { %244 = vmatpush.msra.mxu1 %v243_v23 }
  0x3b   :  { %362 = vmatpush.msrb.mxu0 %v175_v37  ;;  %246 = vmatmul.f32.vlgmr.msra.gmra.mxu1 %v942_v48 }
  0x3c   :  { %516 = vmatpush.msk.msrb.mxu1 %vm74_vm0, %v618_v15 }
  0x3d   :  { %366 = vmatpush.msrb.mxu0 %v181_v44 }
  0x3e   :  { %517 = vmatpush.msk.msrb.mxu1 %vm73_vm1, %v618_v15 }
  0x3f   :  { %370 = vmatpush.msrb.mxu0 %v187_v45 }
  0x40   :  { %518 = vmatpush.msk.msrb.mxu1 %vm72_vm2, %v618_v15 }
  0x41   :  { %374 = vmatpush.msrb.mxu0 %v193_v55 }
  0x42   :  { %519 = vmatpush.msk.msrb.mxu1 %vm71_vm3, %v618_v15 }
  0x43   :  { %378 = vmatpush.msrb.mxu0 %v199_v58 }
  0x44   :  { %520 = vmatpush.msk.msrb.mxu1 %vm70_vm4, %v618_v15 }
  0x45   :  { %382 = vmatpush.msrb.mxu0 %v205_v0 }
  0x46   :  { %521 = vmatpush.msk.msrb.mxu1 %vm69_vm5, %v618_v15 }
  0x47   :  { %386 = vmatpush.msrb.mxu0 %v211_v33 }
  0x48   :  { %522 = vmatpush.msk.msrb.mxu1 %vm68_vm6, %v618_v15 }
  0x49   :  { %390 = vmatpush.msrb.mxu0 %v217_v46 }
  0x4a   :  { %523 = vmatpush.msk.msrb.mxu1 %vm67_vm7, %v618_v15 }
  0x4b   :  { %394 = vmatpush.msrb.mxu0 %v223_v56 }
  0x4c   :  { %524 = vmatpush.msk.msrb.mxu1 %vm66_vm8, %v618_v15 }
  0x4d   :  { %398 = vmatpush.msrb.mxu0 %v229_v62 }
  0x4e   :  { %525 = vmatpush.msk.msrb.mxu1 %vm65_vm9, %v618_v15 }
  0x4f   :  { %402 = vmatpush.msrb.mxu0 %v235_v31 }
  0x50   :  { %526 = vmatpush.msk.msrb.mxu1 %vm64_vm10, %v618_v15 }
  0x51   :  { %406 = vmatpush.msrb.mxu0 %v241_v41 }
  0x52   :  { %527 = vmatpush.msk.msrb.mxu1 %vm63_vm11, %v618_v15  ;;  %408 = vmatmul.f32.vlgmr.msrb.gmra.mxu0 %v942_v48 }
  0x54   :  { %528 = vmatpush.msk.msrb.mxu1 %vm62_vm12, %v618_v15 }
  0x56   :  { %529 = vmatpush.msk.msrb.mxu1 %vm61_vm13, %v618_v15 }
  0x58   :  { %530 = vmatpush.msk.msrb.mxu1 %vm60_vm14, %v618_v15 }
  0x5a   :  { %531 = vmatpush.msk.msrb.mxu1 %vm59_vm15, %v618_v15 }
  0x5b   :  { %445 = vmatmul.f32.vlgmr.msrb.gmra.mxu1 %v942_v48 }
  0xb1   :  { %v146_v3 = vpop.f32.mrf.mxu0 }
  0xb6   :  { %v340_v7 = vpop.f32.mrf.mxu3 }
  0xb8   :  { %v247_v2 = vpop.f32.mrf.mxu1 }
  0xb9   :  { %v248_v4 = vadd.f32 %v247_v2, %v146_v3  ;;  %v301_v5 = vpop.f32.mrf.mxu2 }
  0xbb   :  { %v302_v6 = vadd.f32 %v301_v5, %v248_v4 }
  0xbd   :  { %v341_v9 = vadd.f32 %v340_v7, %v302_v6 }
  0xcf   :  { %v409_v10 = vpop.f32.mrf.mxu0 }
  0xd0   :  { %v410_v11 = vadd.f32 %v409_v10, %v341_v9 }
  0xd8   :  { %v446_v12 = vpop.f32.mrf.mxu1 }
  0xd9   :  { %v447_v1 = vadd.f32 %v446_v12, %v410_v11 }
  0xdb   :  { %449 = vst [vmem:[#allocation7] sm:$0xff] %v447_v1 }
  0xdc   :  { %460 = dma.vmem_to_hbm [thread:$0]  %s456_s1, 128, %s458_s21, [#allocation4]  }
  0xdd   :  { %614 = dma.done.wait [#allocation4], 128  }
  0xde   :  { %615 = vsyncadd [#allocation4], 4294967168 }
  0xdf   :  { %465 = vsyncpa [#allocation3], 1 }
  0xe0   :  { %466 = vsyncpa [#allocation6], 1 }
  0xe1   :  { %467 = vsyncpa [#allocation4], 1 }

</bundles_post_ra>
